<compile_context>
chip_gen: v7x
topology: tpu7x:2x2x1
jax: 0.10.0
libtpu: 0.0.40
codegen_flags: <defaults>
</compile_context>

<pallas_src>
import jax
import jax.numpy as jnp
from jax import lax
from jax.experimental import pallas as pl
from jax.experimental.pallas import tpu as pltpu

EPS = 1e-5
NEG_SLOPE = 0.01  # torch.nn.functional.leaky_relu default


def _leaky_relu(x):
    # Exactly leaky_relu for slope < 1; 2 VPU ops (mul + max) instead of cmp/select/mul.
    return jnp.maximum(x, NEG_SLOPE * x)


def graph_decoder_kernel(x_ref, w1_ref, b1_ref, w2_ref, b2_ref, o_ref):
    # x_ref:  (BN, C_in, TL)   lane dim = TL (length)  -> every load/store lane-dense
    # w1_ref: (H, C_in)         b1_ref: (H, 1)          (BatchNorm folded in)
    # w2_ref: (C_out, H)        b2_ref: (C_out, 1)
    # o_ref:  (BN, C_out, TL)
    w1 = w1_ref[...]
    b1 = b1_ref[...]
    w2 = w2_ref[...]
    b2 = b2_ref[...]
    # BN is a small static constant (<= 16): unroll batch rows; each row is a plain
    # (channels x TL) MXU matmul and the (H, TL) hidden tile never leaves VMEM.
    for b in range(x_ref.shape[0]):
        x = x_ref[b]                                                   # (C_in, TL)
        # conv1 with folded BatchNorm (default MXU precision: deliberate, see header).
        h = jnp.dot(w1, x, preferred_element_type=jnp.float32) + b1
        a = _leaky_relu(h)
        # conv2
        y = jnp.dot(w2, a, preferred_element_type=jnp.float32) + b2
        o_ref[b] = _leaky_relu(y).astype(o_ref.dtype)


def _largest_divisor_le(n, cap):
    for d in range(min(n, cap), 0, -1):
        if n % d == 0:
            return d
    return 1


def _choose_blocks(N, C_in, C_out, L):
    """Pick (batch rows per block BN, lane tile TL, number of lane tiles).

    Targets ~0.5-1 MB of input+output per grid step (HBM-bound op; ~0.35 us per-step
    pipeline overhead) while keeping per-block VMEM small (fits v5e's 16 MiB scoped
    default and v7x's 64 MiB VMEM) and keeping enough grid steps for v7x's two cores.
    """
    TL_CAP = 8192                        # 12 ch * 4 B * 8192 = 384 KB per batch row/step
    TL = L if L <= TL_CAP else TL_CAP    # full-extent block (always legal) or mult. of 128
    grid_l = pl.cdiv(L, TL)              # ragged tail OK: pointwise over L, stores masked
    row_bytes = (C_in + C_out) * TL * 4
    bn_cap = int(max(1, min(16, (1 << 20) // max(row_bytes, 1))))
    BN = _largest_divisor_le(N, bn_cap)  # divisor of N -> no ragged batch blocks
    # v7x has two TensorCores: keep >= ~4 grid steps when possible so both get work.
    while BN > 1 and (N // BN) * grid_l < 4:
        BN = _largest_divisor_le(N, BN - 1)
    return BN, TL, grid_l


def graph_decoder_forward(x_ncl, params):
    """x_ncl: (N, C_in, L) float32, native PyTorch Conv1d layout. Returns (N, C_out, L)."""
    w1, b1, gamma, beta, w2, b2 = params          # w1: (H, C_in), w2: (C_out, H)
    N, C_in, L = x_ncl.shape
    H = w1.shape[0]
    C_out = w2.shape[0]
    M = N * L
    HI = lax.Precision.HIGHEST

    # ---- BN batch stats from raw input moments (no x-sized centered temp in HBM) ----
    # NOTE: E[xx^T] - mu mu^T only cancels badly if |mean| >> std; fine for decoder inputs.
    sum_x = jnp.sum(x_ncl, axis=(0, 2))                                        # (C_in,)
    mean_x = sum_x / M
    sxx = jnp.einsum("ncl,ndl->cd", x_ncl, x_ncl, precision=HI) / M            # (C_in,C_in)
    cov_x = sxx - jnp.outer(mean_x, mean_x)                                    # biased cov
    mean_h = jnp.dot(w1, mean_x, precision=HI) + b1                            # (H,)
    var_h = jnp.einsum("hc,cd,hd->h", w1, cov_x, w1, precision=HI)             # (H,) biased
    var_h = jnp.maximum(var_h, 0.0)
    scale = gamma * lax.rsqrt(var_h + EPS)
    w1_eff = w1 * scale[:, None]
    b1_eff = (b1 - mean_h) * scale + beta

    # ---- fused, tiled kernel over (batch blocks, length tiles) ----
    BN, TL, grid_l = _choose_blocks(N, C_in, C_out, L)
    grid = (N // BN, grid_l)

    out = pl.pallas_call(
        graph_decoder_kernel,
        out_shape=jax.ShapeDtypeStruct((N, C_out, L), x_ncl.dtype),
        grid=grid,
        in_specs=[
            pl.BlockSpec((BN, C_in, TL), lambda b, j: (b, 0, j)),
            pl.BlockSpec((H, C_in), lambda b, j: (0, 0)),
            pl.BlockSpec((H, 1), lambda b, j: (0, 0)),
            pl.BlockSpec((C_out, H), lambda b, j: (0, 0)),
            pl.BlockSpec((C_out, 1), lambda b, j: (0, 0)),
        ],
        out_specs=pl.BlockSpec((BN, C_out, TL), lambda b, j: (b, 0, j)),
        compiler_params=pltpu.CompilerParams(
            dimension_semantics=("parallel", "parallel")),
    )(x_ncl, w1_eff, b1_eff[:, None], w2, b2[:, None])

    return out


def init_params(key, n_in, n_hidden, n_out):
    """Synthetic init matching the PyTorch module's __init__ (channel-major weights).

    conv weights: xavier_normal_ (gain=1) on (out, in, 1); conv biases: PyTorch default
    U(-1/sqrt(fan_in), 1/sqrt(fan_in)); BatchNorm affine: gamma=1, beta=0.
    """
    k1, k2, k3, k4 = jax.random.split(key, 4)

    std1 = (2.0 / (n_in + n_hidden)) ** 0.5
    w1 = jax.random.normal(k1, (n_hidden, n_in), jnp.float32) * std1
    bound1 = 1.0 / (n_in ** 0.5)
    b1 = jax.random.uniform(k2, (n_hidden,), jnp.float32, -bound1, bound1)

    gamma = jnp.ones((n_hidden,), jnp.float32)
    beta = jnp.zeros((n_hidden,), jnp.float32)

    std2 = (2.0 / (n_hidden + n_out)) ** 0.5
    w2 = jax.random.normal(k3, (n_out, n_hidden), jnp.float32) * std2
    bound2 = 1.0 / (n_hidden ** 0.5)
    b2 = jax.random.uniform(k4, (n_out,), jnp.float32, -bound2, bound2)

    return (w1, b1, gamma, beta, w2, b2)


def reference_forward(x_ncl, params):
    """Pure-JAX reference mirroring the PyTorch forward in training mode (direct BN stats)."""
    w1, b1, gamma, beta, w2, b2 = params
    h = jnp.einsum("hc,ncl->nhl", w1, x_ncl) + b1[None, :, None]
    mean = jnp.mean(h, axis=(0, 2), keepdims=True)
    var = jnp.mean((h - mean) ** 2, axis=(0, 2), keepdims=True)
    hn = (h - mean) / jnp.sqrt(var + EPS) * gamma[None, :, None] + beta[None, :, None]
    a = _leaky_relu(hn)
    y = jnp.einsum("oh,nhl->nol", w2, a) + b2[None, :, None]
    return _leaky_relu(y)


if __name__ == "__main__":
    n_in, n_hidden, n_out = 4, 32, 8
    key = jax.random.PRNGKey(0)
    kx1, kx2, kp = jax.random.split(key, 3)
    params = init_params(kp, n_in, n_hidden, n_out)

    # Primary case: lane-dense full-L tiles, one grid step per batch row.
    x1 = jax.random.normal(kx1, (2, n_in, 256), jnp.float32)
    out1 = jax.block_until_ready(graph_decoder_forward(x1, params))
    ref1 = reference_forward(x1, params)
    assert out1.shape == (2, n_out, 256)
    assert jnp.allclose(out1, ref1, atol=1e-4, rtol=1e-4), "mismatch vs JAX reference (L=256)"

    # Small-L case: sub-128 full-extent lane block.
    x2 = jax.random.normal(kx2, (2, n_in, 16), jnp.float32)
    out2 = jax.block_until_ready(graph_decoder_forward(x2, params))
    ref2 = reference_forward(x2, params)
    assert out2.shape == (2, n_out, 16)
    assert jnp.allclose(out2, ref2, atol=1e-4, rtol=1e-4), "mismatch vs JAX reference (L=16)"

    print("KERNEL_OK")
</pallas_src>

<mosaic_0001>
module attributes {stable_mosaic.version = 11 : i64} {
  func.func @graph_decoder_kernel(%arg0: i32, %arg1: i32, %arg2: memref<1x4x256xf32, #tpu.memory_space<vmem>>, %arg3: memref<32x4xf32, #tpu.memory_space<vmem>>, %arg4: memref<32x1xf32, #tpu.memory_space<vmem>>, %arg5: memref<8x32xf32, #tpu.memory_space<vmem>>, %arg6: memref<8x1xf32, #tpu.memory_space<vmem>>, %arg7: memref<1x8x256xf32, #tpu.memory_space<vmem>>) attributes {dimension_semantics = [#tpu.dimension_semantics<parallel>, #tpu.dimension_semantics<parallel>], iteration_bounds = array<i64: 2, 1>, scalar_prefetch = 0 : i64, scratch_operands = 0 : i64, tpu.core_type = #tpu.core_type<tc>, window_params = [{transform_indices = @transform_0, window_bounds = array<i64: 1, 4, 256>}, {pipeline_mode = #tpu.pipeline_mode<synchronous>, transform_indices = @transform_1, window_bounds = array<i64: 32, 4>}, {pipeline_mode = #tpu.pipeline_mode<synchronous>, transform_indices = @transform_2, window_bounds = array<i64: 32, 1>}, {pipeline_mode = #tpu.pipeline_mode<synchronous>, transform_indices = @transform_3, window_bounds = array<i64: 8, 32>}, {pipeline_mode = #tpu.pipeline_mode<synchronous>, transform_indices = @transform_4, window_bounds = array<i64: 8, 1>}, {transform_indices = @transform_5, window_bounds = array<i64: 1, 8, 256>}]} {
    %c0 = arith.constant 0 : index
    %c0_0 = arith.constant 0 : index
    %0 = vector.load %arg3[%c0, %c0_0] : memref<32x4xf32, #tpu.memory_space<vmem>>, vector<32x4xf32>
    %c0_1 = arith.constant 0 : index
    %c0_2 = arith.constant 0 : index
    %1 = vector.load %arg4[%c0_1, %c0_2] : memref<32x1xf32, #tpu.memory_space<vmem>>, vector<32x1xf32>
    %c0_3 = arith.constant 0 : index
    %c0_4 = arith.constant 0 : index
    %2 = vector.load %arg5[%c0_3, %c0_4] : memref<8x32xf32, #tpu.memory_space<vmem>>, vector<8x32xf32>
    %c0_5 = arith.constant 0 : index
    %c0_6 = arith.constant 0 : index
    %3 = vector.load %arg6[%c0_5, %c0_6] : memref<8x1xf32, #tpu.memory_space<vmem>>, vector<8x1xf32>
    %c0_7 = arith.constant 0 : index
    %c0_8 = arith.constant 0 : index
    %c0_9 = arith.constant 0 : index
    %4 = vector.load %arg2[%c0_7, %c0_8, %c0_9] : memref<1x4x256xf32, #tpu.memory_space<vmem>>, vector<1x4x256xf32>
    %5 = vector.shape_cast %4 : vector<1x4x256xf32> to vector<4x256xf32>
    %cst = arith.constant dense<0.000000e+00> : vector<32x256xf32>
    %6 = tpu.matmul %0, %5, %cst {dimension_numbers = #tpu.dot_dimension_numbers<[1], [0], [0], [1], [0, 0, 1, 1], [], []>} : vector<32x4xf32>, vector<4x256xf32>, vector<32x256xf32> -> vector<32x256xf32>
    %7 = vector.broadcast %1 : vector<32x1xf32> to vector<32x256xf32>
    %8 = arith.addf %6, %7 : vector<32x256xf32>
    %cst_10 = arith.constant 0.00999999977 : f32
    %9 = vector.broadcast %cst_10 : f32 to vector<32x256xf32>
    %10 = arith.mulf %9, %8 : vector<32x256xf32>
    %11 = arith.maximumf %8, %10 : vector<32x256xf32>
    %cst_11 = arith.constant dense<0.000000e+00> : vector<8x256xf32>
    %12 = tpu.matmul %2, %11, %cst_11 {dimension_numbers = #tpu.dot_dimension_numbers<[1], [0], [0], [1], [0, 0, 1, 1], [], []>} : vector<8x32xf32>, vector<32x256xf32>, vector<8x256xf32> -> vector<8x256xf32>
    %13 = vector.broadcast %3 : vector<8x1xf32> to vector<8x256xf32>
    %14 = arith.addf %12, %13 : vector<8x256xf32>
    %cst_12 = arith.constant 0.00999999977 : f32
    %15 = vector.broadcast %cst_12 : f32 to vector<8x256xf32>
    %16 = arith.mulf %15, %14 : vector<8x256xf32>
    %17 = arith.maximumf %14, %16 : vector<8x256xf32>
    %c0_13 = arith.constant 0 : index
    %c0_14 = arith.constant 0 : index
    %c0_15 = arith.constant 0 : index
    %18 = vector.load %arg7[%c0_13, %c0_14, %c0_15] : memref<1x8x256xf32, #tpu.memory_space<vmem>>, vector<1x8x256xf32>
    %19 = vector.shape_cast %18 : vector<1x8x256xf32> to vector<8x256xf32>
    %20 = vector.shape_cast %17 : vector<8x256xf32> to vector<1x8x256xf32>
    tpu.vector_store %arg7[%c0_13, %c0_14, %c0_15], %20 {strides = array<i32>} : memref<1x8x256xf32, #tpu.memory_space<vmem>>, vector<1x8x256xf32>,
    return
  }
  func.func @transform_0(%arg0: i32, %arg1: i32) -> (i32, i32, i32) {
    %c0_i32 = arith.constant 0 : i32
    %c0_i32_0 = arith.constant 0 : i32
    return %arg0, %c0_i32, %arg1 : i32, i32, i32
  }
  func.func @transform_1(%arg0: i32, %arg1: i32) -> (i32, i32) {
    %c0_i32 = arith.constant 0 : i32
    %c0_i32_0 = arith.constant 0 : i32
    %c0_i32_1 = arith.constant 0 : i32
    return %c0_i32, %c0_i32_0 : i32, i32
  }
  func.func @transform_2(%arg0: i32, %arg1: i32) -> (i32, i32) {
    %c0_i32 = arith.constant 0 : i32
    %c0_i32_0 = arith.constant 0 : i32
    %c0_i32_1 = arith.constant 0 : i32
    return %c0_i32, %c0_i32_0 : i32, i32
  }
  func.func @transform_3(%arg0: i32, %arg1: i32) -> (i32, i32) {
    %c0_i32 = arith.constant 0 : i32
    %c0_i32_0 = arith.constant 0 : i32
    %c0_i32_1 = arith.constant 0 : i32
    return %c0_i32, %c0_i32_0 : i32, i32
  }
  func.func @transform_4(%arg0: i32, %arg1: i32) -> (i32, i32) {
    %c0_i32 = arith.constant 0 : i32
    %c0_i32_0 = arith.constant 0 : i32
    %c0_i32_1 = arith.constant 0 : i32
    return %c0_i32, %c0_i32_0 : i32, i32
  }
  func.func @transform_5(%arg0: i32, %arg1: i32) -> (i32, i32, i32) {
    %c0_i32 = arith.constant 0 : i32
    %c0_i32_0 = arith.constant 0 : i32
    return %arg0, %c0_i32, %arg1 : i32, i32, i32
  }
}

</mosaic_0001>

<bundles_post_ra>
// kernel: tpu_custom_call.1
= control target key start
LH: loop header
LB: loop body
LE: loop exit
PB: predicated region body
PF: predicated region fallthrough
CT: control target
= control target key end

     0   :  { %10 = vsyncpa [#allocation3], 0  ;;  %s934_s0 = inlined_call_operand.vmem [shape: f32[2,4,256], index: 0, kind: input, shape index: {}]   ;;  %s935_s1 = inlined_call_operand.vmem [shape: f32[32,4], index: 1, kind: input, shape index: {}]   ;;  %s936_s2 = inlined_call_operand.vmem [shape: f32[32,1], index: 2, kind: input, shape index: {}]   ;;  %s937_s3 = inlined_call_operand.vmem [shape: f32[8,32], index: 3, kind: input, shape index: {}]   ;;  %s938_s4 = inlined_call_operand.vmem [shape: f32[8,1], index: 4, kind: input, shape index: {}]   ;;  %s939_s5 = inlined_call_operand.hbm [shape: f32[2,8,256], index: 5, kind: output, shape index: {}]  }
   0x1   :  { %12 = vsyncpa [#allocation3 + $0x1], 0  ;;  %s792_s18 = smov 0   ;;  %s794_s19 = smov 0  }
   0x2   :  { %s796_s20 = smov 0   ;;  %s798_s21 = smov 0  }
   0x3   :  { %s800_s22 = smov 0   ;;  %s802_s23 = smov 0  }
   0x4 LB: > { %s589_s24 = sadd.s32 4294967295, %s757_s23   ;;  %s590_s25 = sadd.s32 4294967294, %s757_s23   ;;  %s757_s23 = sphi %s802_s23, %s18_s23   ;;  %s753_s22 = sphi %s800_s22, %s946_s22   ;;  %s749_s21 = sphi %s798_s21, %s945_s21   ;;  %s745_s20 = sphi %s796_s20, %s944_s20   ;;  %s741_s19 = sphi %s794_s19, %s943_s19   ;;  %s737_s18 = sphi %s792_s18, %s942_s18  }
   0x5   : > { %s30_s26 = sadd.s32 1, %s753_s22  ;;  %s151_s27 = sadd.s32 1, %s745_s20 }
   0x6   : > { %p32_p0 = scmp.ge.s32.totalorder %s30_s26, 2  ;;  %p161_p1 = scmp.ne.s32.totalorder %s745_s20, %s741_s19 }
   0x7   : > { %p162_p2 = scmp.eq.s32.totalorder %s589_s24, 1  ;;  %p167_p3 = scmp.ne.s32.totalorder %s741_s19, %s737_s18 }
   0x8   : > { %s948_s26 = smov (%p32_p0, %s30_s26), 0  ;;  %p168_p5 = scmp.eq.s32.totalorder %s590_s25, 1 }
   0x9   : > { %p832_p4 = por %p162_p2, %p161_p1  ;;  %s146_s29 = ssub.s32 %s753_s22, %s948_s26 }
   0xa   : > { %p593_p6 = scmp.ge.s32.totalorder %s757_s23, 1  ;;  %p149_p7 = scmp.eq.s32.totalorder %s146_s29, 0 }
   0xb   : > { %p839_p8 = por %p168_p5, %p167_p3  ;;  %p211_p9 = scmp.lt.s32.totalorder %s757_s23, 3 }
   0xc   : > { %s845_s6 = scalar_select %p149_p7, %s745_s20, %s151_s27  }
   0xd   : > { %p212_p10 = pnand %p593_p6, %p211_p9 }
   0xe   : > { %p244_p11 = scmp.lt.s32.totalorder (!%p212_p10), %s749_s21, 1  ;;  %v759_v0 = vmov (!%p212_p10), 0.0   ;;  %v258_v1 = vld [vmem:[%s936_s2] sm:$0xff] (!%p212_p10)  ;;  %v760_v2 = vmov (!%p212_p10), 0   ;;  %v260_v3 = vld [vmem:[%s936_s2 + $0x10] sm:$0xff] (!%p212_p10)  ;;  %v259_v4 = vld [vmem:[%s936_s2 + $0x8] sm:$0xff] (!%p212_p10) }
   0xf   : > { %215 = sbr.rel (%p212_p10) target bundleno = 501 (0x1f5), region = 40  ;;  %369 = vmatprep.mubr.f32.mxu0 (!%p212_p10), %v759_v0  ;;  %483 = vmatprep.mubr.f32.mxu1 (!%p212_p10), %v759_v0  ;;  %v261_v5 = vld [vmem:[%s936_s2 + $0x18] sm:$0xff] (!%p212_p10)  ;;  %vm300_vm0 = vcmask (!%p212_p10), 1043456   ;;  %v254_v8 = vld [vmem:[%s935_s1] sm:$0xff] (!%p212_p10)  ;;  %vm287_vm1 = vcmask (!%p212_p10), 31744   ;;  %v255_v10 = vld [vmem:[%s935_s1 + $0x8] sm:$0xff] (!%p212_p10) }
  0x10   : > { %676 = vset.pattern.permute.xlu0 (!%p212_p10), %v760_v2  ;;  %677 = vset.pattern.permute.xlu1 (!%p212_p10), %v760_v2  ;;  %v263_v9 = vld [vmem:[%s938_s4] sm:$0xff] (!%p212_p10)  ;;  %v256_v11 = vld [vmem:[%s935_s1 + $0x10] sm:$0xff] (!%p212_p10)  ;;  %v257_v12 = vld [vmem:[%s935_s1 + $0x18] sm:$0xff] (!%p212_p10)  ;;  %vm415_vm2 = vcmask (!%p212_p10), 261120   ;;  %s240_s17 = sand.u32 (!%p212_p10), 1, %s741_s19  }
  0x11   : > { %267 = vperm.xlu0 (!%p212_p10), %676, %v258_v1   ;;  %277 = vperm.xlu1 (!%p212_p10), %677, %v260_v3   ;;  %v262_v53 = vld [vmem:[%s937_s3] sm:$0xff] (!%p212_p10)  ;;  %s594_s24 = sshll.u32 (!%p212_p10), %s240_s17, 4  ;;  %s497_s10 = scalar_lea.sflag (!%p212_p10), [#allocation3], %s240_s17 }
  0x12   : > { %s242_s27 = scalar_lea.vmem (!%p212_p10), [#allocation2], %s594_s24 }
  0x13   : > { %s513_s29 = sshll.u32 (!%p212_p10), %s242_s27, 4  ;;  %s889_s29 = int_to_ptr.vmem [resolvable:$true] %s513_s29 }
  0x14   : > { %s679_s11 = scalar_lea.vmem (!%p212_p10), %s889_s29, 256 }
  0x15   : > { %272 = vperm.xlu0 (!%p212_p10), %676, %v259_v4   ;;  %282 = vperm.xlu1 (!%p212_p10), %677, %v261_v5   ;;  %p680_p12 = scmp.ne.s32.totalorder (!%p212_p10), %s889_s29, %s679_s11 }
  0x16   : > { %s245_s9 = scalar_select %p244_p11, %s749_s21, 1 }
  0x17   : > { %p681_p13 = pnand %p680_p12, %p832_p4 }
  0x18   : > { %s609_s12 = sshll.u32 %s245_s9, 3 }
  0x19   : > { %s251_s25 = scalar_lea.vmem %s934_s0, %s609_s12  ;;  %412 = vperm.xlu0 %676, %v263_v9   ;;  %p682_p0 = pneg %p681_p13 }
  0x1a   : > { %v264_v6 = vld [vmem:[%s251_s25] sm:$0xff]  ;;  %s610_s25 = sshll.u32 %s749_s21, 8  ;;  %s761_s21 = smov [#allocation2]  }
  0x1b   : > { %v286_v7 = vcombine.high %v264_v6, %v264_v6  ;;  %s887_s9 = scalar_lea.hbm %s939_s5, %s610_s25  ;;  %s683_s12 = sshll.u32 %s761_s21, 4  ;;  %s684_s12 = int_to_ptr.vmem [resolvable:$false] %s683_s12 }
  0x1c   : > { %s685_s13 = scalar_lea.vmem %s684_s12, 512  ;;  %p686_p1 = scmp.lt.s32.totalorder %s889_s29, %s684_s12 }
  0x1d   : > { %597 = vmatprep.subr.msk.mxu0 %vm300_vm0, %v286_v7  ;;  %p687_p2 = scmp.lt.s32.totalorder %s685_s13, %s679_s11 }
  0x1e   : > { %598 = vmatpush1.msk.msra.mxu0 %vm300_vm0, %v264_v6 }
  0x1f   : > { %599 = vmatmul.mubr.msk.f32.vlgmr.msra.gmra.mrb[0].mxu0 %vm287_vm1, %v254_v8  ;;  %p688_p3 = por %p687_p2, %p686_p1 }
  0x20   : > { %375 = vmatprep.mubr.f32.mxu0 %v759_v0 }
  0x21   : > { %p689_p5 = pnand %p688_p3, %p682_p0 }
  0x23   : > { %600 = vmatmul.mubr.msk.f32.gmra.mrb[2].mxu0 %vm287_vm1, %v255_v10 }
  0x24   : > { %381 = vmatprep.mubr.f32.mxu0 %v759_v0 }
  0x27   : > { %601 = vmatmul.mubr.msk.f32.gmra.mrb[4].mxu0 %vm287_vm1, %v256_v11 }
  0x28   : > { %387 = vmatprep.mubr.f32.mxu0 %v759_v0 }
  0x2b   : > { %602 = vmatmul.mubr.msk.f32.gmra.mrb[6].mxu0 %vm287_vm1, %v257_v12 }
  0x90   : > { %v268_v13 = vpop.permute.xlu0 %267  ;;  %v278_v24 = vpop.permute.xlu1 %277 }
  0x94   : > { %v273_v18 = vpop.permute.xlu0 %272  ;;  %v283_v37 = vpop.permute.xlu1 %282 }
  0x98   : > { %v413_v54 = vpop.permute.xlu0 %412 }
  0xf2   : > { %v371_v14 = vpop.f32.mrb[0].mxu0 }
  0xf3   : > { %v372_v15 = vadd.f32 %v371_v14, %v268_v13  ;;  %v373_v16 = vpop.f32.mrb[1].mxu0 }
  0xf4   : > { %v374_v17 = vadd.f32 %v373_v16, %v268_v13 }
  0xf5   : > { %v394_v20 = vmul.f32 0.01, %v372_v15 }
  0xf6   : > { %v377_v19 = vpop.f32.mrb[2].mxu0  ;;  %v395_v23 = vmul.f32 0.01, %v374_v17 }
  0xf7   : > { %v378_v21 = vadd.f32 %v377_v19, %v273_v18  ;;  %v379_v22 = vpop.f32.mrb[3].mxu0  ;;  %v402_v29 = vmax.f32 %v372_v15, %v394_v20 }
  0xf8   : > { %v380_v25 = vadd.f32 %v379_v22, %v273_v18  ;;  %v403_v34 = vmax.f32 %v374_v17, %v395_v23 }
  0xf9   : > { %v396_v26 = vmul.f32 0.01, %v378_v21 }
  0xfa   : > { %v397_v27 = vmul.f32 0.01, %v380_v25  ;;  %v383_v28 = vpop.f32.mrb[4].mxu0 }
  0xfb   : > { %v404_v30 = vmax.f32 %v378_v21, %v396_v26  ;;  %v384_v31 = vadd.f32 %v383_v28, %v278_v24  ;;  %v385_v32 = vpop.f32.mrb[5].mxu0 }
  0xfc   : > { %v386_v33 = vadd.f32 %v385_v32, %v278_v24  ;;  %v405_v35 = vmax.f32 %v380_v25, %v397_v27 }
  0xfd   : > { %v613_v36 = vpack.c.bf16 %v404_v30, %v402_v29  ;;  %v398_v40 = vmul.f32 0.01, %v384_v31 }
  0xfe   : > { %v389_v38 = vpop.f32.mrb[6].mxu0  ;;  %v611_v39 = vpack.c.bf16 %v405_v35, %v403_v34  ;;  %v399_v43 = vmul.f32 0.01, %v386_v33 }
  0xff   : > { %v390_v41 = vadd.f32 %v389_v38, %v283_v37  ;;  %v391_v42 = vpop.f32.mrb[7].mxu0  ;;  %v406_v47 = vmax.f32 %v384_v31, %v398_v40 }
 0x100   : > { %v392_v44 = vadd.f32 %v391_v42, %v283_v37  ;;  %612 = vmatprep.subr.bf16.mxu1 %v611_v39  ;;  %v407_v49 = vmax.f32 %v386_v33, %v399_v43 }
 0x101   : > { %v400_v45 = vmul.f32 0.01, %v390_v41  ;;  %614 = vmatpush1.bf16.msra.mxu1 %v613_v36 }
 0x102   : > { %v401_v46 = vmul.f32 0.01, %v392_v44 }
 0x103   : > { %v408_v48 = vmax.f32 %v390_v41, %v400_v45 }
 0x104   : > { %v409_v50 = vmax.f32 %v392_v44, %v401_v46 }
 0x105   : > { %v617_v51 = vpack.c.bf16 %v408_v48, %v406_v47 }
 0x106   : > { %v615_v52 = vpack.c.bf16 %v409_v50, %v407_v49 }
 0x108   : > { %616 = vmatprep.subr.bf16.mxu1 %v615_v52 }
 0x109   : > { %618 = vmatpush1.bf16.msra.mxu1 %v617_v51 }
 0x10c   : > { %603 = vmatmul.mubr.msk.f32.vlgmr.msra.gmra.mrb[0].mxu1 %vm415_vm2, %v262_v53 }
 0x1df   : > { %v485_v55 = vpop.f32.mrb[0].mxu1 }
 0x1e0   : > { %v486_v56 = vadd.f32 %v485_v55, %v413_v54  ;;  %v487_v57 = vpop.f32.mrb[1].mxu1 }
 0x1e1   : > { %v488_v58 = vadd.f32 %v487_v57, %v413_v54 }
 0x1e2   : > { %v490_v59 = vmul.f32 0.01, %v486_v56 }
 0x1e3   : > { %v491_v60 = vmul.f32 0.01, %v488_v58 }
 0x1e4   : > { %v492_v61 = vmax.f32 %v486_v56, %v490_v59 }
 0x1e5   : > { %v493_v62 = vmax.f32 %v488_v58, %v491_v60 }
 0x1e6   : > { %494 = vst [vmem:[%s242_s27] sm:$0xff] %v492_v61 }
 0x1e7   : > { %495 = vst [vmem:[%s242_s27 + $0x8] sm:$0xff] %v493_v62 }
 0x1e8   : > { %692 = shalt.err (!%p689_p5)
}
 0x1e9   : > { %s693_s14 = scalar_lea.hbm %s887_s9, 256  ;;  %s697_s17 = scalar_lea.hbm %s939_s5, 512 }
 0x1ea   : > { %p694_p6 = scmp.ne.s32.totalorder %s887_s9, %s693_s14  ;;  %p698_p10 = scmp.lt.u32.totalorder %s887_s9, %s939_s5 }
 0x1eb   : > { %p699_p11 = scmp.lt.u32.totalorder %s697_s17, %s693_s14  ;;  %p701_p13 = scmp.lt.u32.totalorder %s693_s14, %s887_s9 }
 0x1ec   : > { %p695_p7 = pnand %p694_p6, %p832_p4 }
 0x1ed   : > { %p700_p12 = por %p699_p11, %p698_p10 }
 0x1ee   : > { %p696_p9 = pneg %p695_p7 }
 0x1ef   : > { %p702_p0 = por %p701_p13, %p700_p12 }
 0x1f1   : > { %p703_p1 = pnand %p702_p0, %p696_p9 }
 0x1f3   : > { %706 = shalt.err (!%p703_p1)
}
 0x1f4   : > { %619 = dma.vmem_to_hbm [thread:$0]  (%p832_p4), %s889_s29, 256, %s887_s9, %s497_s10  }
 0x1f5 PF: > { %p625_p2 = scmp.ge.s32.totalorder %s757_s23, 2  ;;  %s525_s27 = sand.u32 1, %s737_s18  }
 0x1f6   : > { %s526_s7 = scalar_lea.sflag [#allocation3], %s525_s27 }
 0x1f7   : > { %p622_p3 = pnand %p625_p2, %p839_p8 }
 0x1f9   : > { %732 = dma.done.wait (!%p622_p3), %s526_s7, 256  }
 0x1fa   : > { %734 = vsyncadd (!%p622_p3), %s526_s7, 4294967040  ;;  %s18_s23 = sadd.s32 1, %s757_s23   ;;  %s942_s18 = smov %s741_s19 }
 0x1fb   : > { %p15_p5 = scmp.ge.s32.totalorder %s18_s23, 4   ;;  %s943_s19 = smov %s745_s20 }
 0x1fc   : > { %s944_s20 = smov %s845_s6  ;;  %s945_s21 = smov %s753_s22 }
 0x1fd   : > { %s946_s22 = smov %s948_s26  ;;  %17 = sbr.rel (!%p15_p5) target bundleno = 4 (0x4), region = 75 }
 0x204   :  { %531 = vsyncpa [#allocation3], 1 }
 0x205   :  { %533 = vsyncpa [#allocation3 + $0x1], 1 }

</bundles_post_ra>
